<compile_context>
chip_gen: v6e
topology: v6e:2x2x1
jax: 0.10.0
libtpu: 0.0.40
codegen_flags: <defaults>
</compile_context>

<pallas_src>
import math
from functools import partial

import jax
import jax.numpy as jnp
from jax import lax
from jax.experimental import pallas as pl
from jax.experimental.pallas import tpu as pltpu


# ------------------------------ Pallas kernel ------------------------------ #

def _attention_importance_kernel(x_ref, w_ref, imp_ref, *, dim_q):
    """x:(N, D+1) f32 with a ones column appended (bias folded into matmul),
    w:(D+1, 2*dim_q) = [[Wq^T*scale | Wk^T]; [bq*scale | bk]].

    Writes imp:(1, N) = sum over rows of softmax(Q K^T / sqrt(D), axis=-1)."""
    x = x_ref[...]                                                   # (N, D+1)

    # Fused, bias-folded Q/K projection: a single MXU matmul. The 1/sqrt(D)
    # scale is pre-folded into the Q half of the weights/bias.
    qk = jnp.dot(x, w_ref[...], preferred_element_type=jnp.float32)  # (N, 2dq)
    # Keep 2*dim_q <= 128 so this lane slice stays inside one lane tile.
    q = qk[:, :dim_q]                                                # scaled Q
    k = qk[:, dim_q:]                                                # keys

    # scores = (Q K^T) / sqrt(D); contraction on the last axis of BOTH
    # operands so no explicit transpose of k is materialized.
    scores = lax.dot_general(q, k, (((1,), (1,)), ((), ())),
                             preferred_element_type=jnp.float32)     # (N, N)

    # Row softmax + column-sum of the normalized rows, reformulated so the
    # O(N^2) normalization work moves onto the (idle) MXU:
    #   imp_j = sum_i e_ij / s_i == ones(1,N) @ (E * (1/s))
    # Only N exact divides remain; no N^2 VPU divides, no XLU axis-0 reduce,
    # and no relayout of the (N,1) reciprocal is needed.
    m = jnp.max(scores, axis=-1, keepdims=True)
    e = jnp.exp(scores - m)
    s = jnp.sum(e, axis=-1, keepdims=True)                           # (N, 1)
    r = 1.0 / s                                                      # N divides
    n = scores.shape[0]
    ones_row = jnp.ones((1, n), jnp.float32)
    imp_ref[...] = jnp.dot(ones_row, e * r,
                           preferred_element_type=jnp.float32)       # (1, N)


def patch_importance(flat_patches, wq, bq, wk, bk):
    """flat_patches:(B, N, D); wq/wk:(dim_q, D); bq/bk:(dim_q,) -> (B, N)."""
    B, N, D = flat_patches.shape
    dim_q = wq.shape[0]
    scale = 1.0 / math.sqrt(D)          # PyTorch divides by sqrt(X.size(-1))

    # One-time wrapper-side fusion:
    #  - pre-transpose weights to (D, 2*dim_q), fold 1/sqrt(D) into the Q half
    #  - fold the bias into the matmul (ones column on X, bias row on W)
    x_aug = jnp.concatenate(
        [flat_patches, jnp.ones((B, N, 1), flat_patches.dtype)], axis=-1)
    w_aug = jnp.concatenate(
        [jnp.concatenate([wq.T * scale, wk.T], axis=1),              # (D, 2dq)
         jnp.concatenate([bq * scale, bk]).reshape(1, 2 * dim_q)],   # (1, 2dq)
        axis=0)                                                      # (D+1,2dq)
    D1 = D + 1

    kernel = partial(_attention_importance_kernel, dim_q=dim_q)

    # Advisory cost estimate: lets the XLA scheduler treat this custom call as
    # tiny and overlap it with the surrounding patch extraction / top_k.
    flops = B * (2 * N * D1 * 2 * dim_q + 2 * N * N * dim_q + 2 * N * N)
    cost = pl.CostEstimate(
        flops=flops,
        transcendentals=B * N * N,
        bytes_accessed=4 * (B * N * D1 + D1 * 2 * dim_q + B * N))

    imp = pl.pallas_call(
        kernel,
        out_shape=jax.ShapeDtypeStruct((B, 1, N), jnp.float32),
        # One grid step per frame; everything for a frame is one VMEM-resident
        # block (no K/N micro-tiling -- at these shapes grid steps cost more
        # than the matmuls). Weights use a constant index_map so they are not
        # re-DMA'd per step.  NOTE(scaling): if N ever grows so the (N,N)
        # scores matrix approaches the scoped-VMEM limit (v7x: 32 MiB default,
        # 64 MiB physical), switch to a flash-style online-softmax tiling over
        # the key axis or raise pltpu.CompilerParams(vmem_limit_bytes=...).
        grid=(B,),
        in_specs=[
            pl.BlockSpec((None, N, D1), lambda b: (b, 0, 0)),        # X frame b
            pl.BlockSpec((D1, 2 * dim_q), lambda b: (0, 0)),         # weights
        ],
        out_specs=pl.BlockSpec((None, 1, N), lambda b: (b, 0, 0)),
        compiler_params=pltpu.CompilerParams(
            dimension_semantics=("parallel",)),      # shard frames on v7x 2xTC
        cost_estimate=cost,
    )(x_aug, w_aug)
    return imp[:, 0, :]                                              # (B, N)


# ------------------------- wrapper-side layout code ------------------------ #

def extract_flattened_patches(img_chw, *, patch_size, patch_stride):
    """Replicates Exp3Agent's unfold/permute/reshape patch extraction.

    img_chw:(C,H,W) -> (N, C*patch_size**2), per-patch feature order
    (row, col, channel), identical to the PyTorch reshape order."""
    x = jnp.transpose(img_chw, (1, 2, 0))                           # (H, W, C)
    H, W, C = x.shape
    n = (H - patch_size) // patch_stride + 1
    starts = jnp.arange(n) * patch_stride
    offs = starts[:, None] + jnp.arange(patch_size)[None, :]        # (n, P)
    # patches[i, j, pr, pc, c] = x[i*S + pr, j*S + pc, c]
    patches = x[offs[:, None, :, None], offs[None, :, None, :], :]  # (n,n,P,P,C)
    return patches.reshape(n * n, patch_size * patch_size * C)


def make_patch_centers(image_size, patch_size, patch_stride):
    n = (image_size - patch_size) // patch_stride + 1
    offset = patch_size // 2
    grid = offset + jnp.arange(n, dtype=jnp.float32) * patch_stride
    rr, cc = jnp.meshgrid(grid, grid, indexing="ij")
    return jnp.stack([rr.reshape(-1), cc.reshape(-1)], axis=-1)     # (n*n, 2)


def exp3_forward_batched(imgs_bchw, wq, bq, wk, bk, *, image_size, patch_size,
                         patch_stride, top_k, patch_centers,
                         normalize_positions=True):
    """Batch of frames -> (centers (B, 2*top_k), importance (B, N))."""
    B = imgs_bchw.shape[0]
    extract = partial(extract_flattened_patches, patch_size=patch_size,
                      patch_stride=patch_stride)
    flat = jax.vmap(extract)(imgs_bchw)                             # (B, N, D)
    importance = patch_importance(flat, wq, bq, wk, bk)             # (B, N)
    _, top_ix = lax.top_k(importance, top_k)                        # (B, top_k)
    centers = patch_centers[top_ix].reshape(B, -1)                  # (B, 2*k)
    if normalize_positions:
        centers = centers / image_size
    return centers, importance


def exp3_forward(img_chw, wq, bq, wk, bk, **kw):
    """Single-frame convenience wrapper (matches the PyTorch forward)."""
    centers, importance = exp3_forward_batched(img_chw[None], wq, bq, wk, bk,
                                               **kw)
    return centers[0], importance[0]


def exp3_forward_ref(img_chw, wq, bq, wk, bk, *, image_size, patch_size,
                     patch_stride, top_k, patch_centers,
                     normalize_positions=True):
    """Pure-JAX single-frame reference matching the PyTorch forward."""
    flat = extract_flattened_patches(img_chw, patch_size=patch_size,
                                     patch_stride=patch_stride)
    q = flat @ wq.T + bq
    k = flat @ wk.T + bk
    scores = (q @ k.T) / math.sqrt(flat.shape[-1])
    pim = jax.nn.softmax(scores, axis=-1)
    importance = pim.sum(axis=0)
    _, top_ix = lax.top_k(importance, top_k)
    centers = patch_centers[top_ix].reshape(-1)
    if normalize_positions:
        centers = centers / image_size
    return centers, importance


if __name__ == "__main__":
    # Small Exp3Agent-consistent shapes:
    #   batch of 2 frames, 16x16 RGB images, 4x4 patches with stride 2
    #   -> n=7, N=49 patches, attention data_dim D = 3*4*4 = 48,
    #   query_dim = 8, top_k = 5.
    batch = 2
    image_size, patch_size, patch_stride = 16, 4, 2
    channels, query_dim, top_k = 3, 8, 5
    data_dim = channels * patch_size ** 2

    key = jax.random.PRNGKey(0)
    kx, kwq, kbq, kwk, kbk = jax.random.split(key, 5)

    imgs = jax.random.uniform(
        kx, (batch, channels, image_size, image_size), jnp.float32)

    bound = 1.0 / math.sqrt(data_dim)       # nn.Linear default init range
    wq = jax.random.uniform(kwq, (query_dim, data_dim), jnp.float32, -bound, bound)
    bq = jax.random.uniform(kbq, (query_dim,), jnp.float32, -bound, bound)
    wk = jax.random.uniform(kwk, (query_dim, data_dim), jnp.float32, -bound, bound)
    bk = jax.random.uniform(kbk, (query_dim,), jnp.float32, -bound, bound)

    patch_centers = make_patch_centers(image_size, patch_size, patch_stride)
    cfg = dict(image_size=image_size, patch_size=patch_size,
               patch_stride=patch_stride, top_k=top_k,
               patch_centers=patch_centers)

    centers, imp = exp3_forward_batched(imgs, wq, bq, wk, bk, **cfg)
    centers = jax.block_until_ready(centers)
    imp = jax.block_until_ready(imp)

    assert centers.shape == (batch, 2 * top_k), centers.shape
    for b in range(batch):
        centers_ref, imp_ref = exp3_forward_ref(imgs[b], wq, bq, wk, bk, **cfg)
        assert jnp.allclose(imp[b], imp_ref, atol=1e-4, rtol=1e-4), \
            f"importance mismatch on frame {b}"
        assert jnp.allclose(centers[b], centers_ref, atol=1e-6, rtol=1e-6), \
            f"centers mismatch on frame {b}"

    # Single-frame API (B == 1) still works and matches too.
    c1, i1 = exp3_forward(imgs[0], wq, bq, wk, bk, **cfg)
    c1 = jax.block_until_ready(c1)
    centers_ref, imp_ref = exp3_forward_ref(imgs[0], wq, bq, wk, bk, **cfg)
    assert jnp.allclose(i1, imp_ref, atol=1e-4, rtol=1e-4)
    assert jnp.allclose(c1, centers_ref, atol=1e-6, rtol=1e-6)

    print("KERNEL_OK")
</pallas_src>

<mosaic_0001>
module attributes {stable_mosaic.version = 11 : i64} {
  func.func @_attention_importance_kernel(%arg0: i32, %arg1: memref<1x49x49xf32, #tpu.memory_space<vmem>>, %arg2: memref<49x16xf32, #tpu.memory_space<vmem>>, %arg3: memref<1x1x49xf32, #tpu.memory_space<vmem>>) attributes {dimension_semantics = [#tpu.dimension_semantics<parallel>], iteration_bounds = array<i64: 2>, scalar_prefetch = 0 : i64, scratch_operands = 0 : i64, tpu.core_type = #tpu.core_type<tc>, window_params = [{transform_indices = @transform_0, window_bounds = array<i64: 1, 49, 49>}, {pipeline_mode = #tpu.pipeline_mode<synchronous>, transform_indices = @transform_1, window_bounds = array<i64: 49, 16>}, {transform_indices = @transform_2, window_bounds = array<i64: 1, 1, 49>}]} {
    %c0 = arith.constant 0 : index
    %c0_0 = arith.constant 0 : index
    %c0_1 = arith.constant 0 : index
    %0 = vector.load %arg1[%c0, %c0_0, %c0_1] : memref<1x49x49xf32, #tpu.memory_space<vmem>>, vector<1x49x49xf32>
    %1 = vector.shape_cast %0 : vector<1x49x49xf32> to vector<49x49xf32>
    %c0_2 = arith.constant 0 : index
    %c0_3 = arith.constant 0 : index
    %2 = vector.load %arg2[%c0_2, %c0_3] : memref<49x16xf32, #tpu.memory_space<vmem>>, vector<49x16xf32>
    %cst = arith.constant dense<0.000000e+00> : vector<49x16xf32>
    %3 = tpu.matmul %1, %2, %cst {dimension_numbers = #tpu.dot_dimension_numbers<[1], [0], [0], [1], [0, 0, 1, 1], [], []>} : vector<49x49xf32>, vector<49x16xf32>, vector<49x16xf32> -> vector<49x16xf32>
    %4 = vector.extract_strided_slice %3 {offsets = [0, 0], sizes = [49, 8], strides = [1, 1]} : vector<49x16xf32> to vector<49x8xf32>
    %5 = vector.extract_strided_slice %3 {offsets = [0, 8], sizes = [49, 8], strides = [1, 1]} : vector<49x16xf32> to vector<49x8xf32>
    %cst_4 = arith.constant dense<0.000000e+00> : vector<49x49xf32>
    %6 = tpu.matmul %4, %5, %cst_4 {dimension_numbers = #tpu.dot_dimension_numbers<[1], [1], [0], [0], [0, 0, 1, 0], [], []>} : vector<49x8xf32>, vector<49x8xf32>, vector<49x49xf32> -> vector<49x49xf32>
    %cst_5 = arith.constant dense<0xFF800000> : vector<49xf32>
    %7 = vector.multi_reduction <maximumf>, %6, %cst_5 [1] : vector<49x49xf32> to vector<49xf32>
    %8 = vector.shape_cast %7 : vector<49xf32> to vector<49x1xf32>
    %9 = vector.broadcast %8 : vector<49x1xf32> to vector<49x49xf32>
    %10 = arith.subf %6, %9 : vector<49x49xf32>
    %11 = math.exp %10 : vector<49x49xf32>
    %cst_6 = arith.constant dense<0.000000e+00> : vector<49xf32>
    %12 = vector.multi_reduction <add>, %11, %cst_6 [1] : vector<49x49xf32> to vector<49xf32>
    %13 = vector.shape_cast %12 : vector<49xf32> to vector<49x1xf32>
    %cst_7 = arith.constant 1.000000e+00 : f32
    %14 = vector.broadcast %cst_7 : f32 to vector<49x1xf32>
    %15 = arith.divf %14, %13 : vector<49x1xf32>
    %cst_8 = arith.constant 1.000000e+00 : f32
    %16 = vector.broadcast %cst_8 : f32 to vector<1x49xf32>
    %17 = vector.broadcast %15 : vector<49x1xf32> to vector<49x49xf32>
    %18 = arith.mulf %11, %17 : vector<49x49xf32>
    %cst_9 = arith.constant dense<0.000000e+00> : vector<1x49xf32>
    %19 = tpu.matmul %16, %18, %cst_9 {dimension_numbers = #tpu.dot_dimension_numbers<[1], [0], [0], [1], [0, 0, 1, 1], [], []>} : vector<1x49xf32>, vector<49x49xf32>, vector<1x49xf32> -> vector<1x49xf32>
    %c0_10 = arith.constant 0 : index
    %c0_11 = arith.constant 0 : index
    %c0_12 = arith.constant 0 : index
    %20 = vector.load %arg3[%c0_10, %c0_11, %c0_12] : memref<1x1x49xf32, #tpu.memory_space<vmem>>, vector<1x1x49xf32>
    %21 = vector.shape_cast %20 : vector<1x1x49xf32> to vector<1x49xf32>
    %22 = vector.shape_cast %19 : vector<1x49xf32> to vector<1x1x49xf32>
    tpu.vector_store %arg3[%c0_10, %c0_11, %c0_12], %22 {strides = array<i32>} : memref<1x1x49xf32, #tpu.memory_space<vmem>>, vector<1x1x49xf32>,
    return
  }
  func.func @transform_0(%arg0: i32) -> (i32, i32, i32) {
    %c0_i32 = arith.constant 0 : i32
    %c0_i32_0 = arith.constant 0 : i32
    %c0_i32_1 = arith.constant 0 : i32
    return %arg0, %c0_i32, %c0_i32_0 : i32, i32, i32
  }
  func.func @transform_1(%arg0: i32) -> (i32, i32) {
    %c0_i32 = arith.constant 0 : i32
    %c0_i32_0 = arith.constant 0 : i32
    %c0_i32_1 = arith.constant 0 : i32
    return %c0_i32, %c0_i32_0 : i32, i32
  }
  func.func @transform_2(%arg0: i32) -> (i32, i32, i32) {
    %c0_i32 = arith.constant 0 : i32
    %c0_i32_0 = arith.constant 0 : i32
    %c0_i32_1 = arith.constant 0 : i32
    return %arg0, %c0_i32, %c0_i32_0 : i32, i32, i32
  }
}

</mosaic_0001>

<bundles_post_ra>
// kernel: tpu_custom_call.1
= control target key start
LH: loop header
LB: loop body
LE: loop exit
PB: predicated region body
PF: predicated region fallthrough
CT: control target
= control target key end

     0   :  { %7 = vsyncpa [#allocation3], 0  ;;  %s1180_s0 = inlined_call_operand.vmem [shape: f32[2,49,49], index: 0, kind: input, shape index: {}]   ;;  %s1181_s1 = inlined_call_operand.vmem [shape: f32[49,16], index: 1, kind: input, shape index: {}]   ;;  %s1182_s2 = inlined_call_operand.hbm [shape: f32[2,1,49], index: 2, kind: output, shape index: {}]  }
   0x1   :  { %9 = vsyncpa [#allocation3 + $0x1], 0  ;;  %s970_s9 = smov 0   ;;  %s972_s10 = smov 0  }
   0x2   :  { %s974_s11 = smov 0   ;;  %s976_s12 = smov 0  }
   0x3 LB: > { %s991_s13 = sadd.s32 4294967295, %s948_s12   ;;  %s661_s14 = sadd.s32 4294967294, %s948_s12   ;;  %s948_s12 = sphi %s976_s12, %s1188_s12   ;;  %s944_s11 = sphi %s974_s11, %s1187_s11   ;;  %s940_s10 = sphi %s972_s10, %s1186_s10   ;;  %s936_s9 = sphi %s970_s9, %s1185_s9  }
   0x4   : > { %s995_s15 = sadd.s32 1, %s948_s12   ;;  %s69_s16 = sadd.s32 1, %s944_s11 }
   0x5   : > { %s66_s17 = ssub.s32 %s948_s12, %s995_s15  ;;  %p79_p0 = scmp.ne.s32.totalorder %s944_s11, %s940_s10 }
   0x6   : > { %p67_p1 = scmp.eq.s32.totalorder %s66_s17, 0  ;;  %p80_p2 = scmp.eq.s32.totalorder %s991_s13, 1 }
   0x7   : > { %p85_p3 = scmp.ne.s32.totalorder %s940_s10, %s936_s9  ;;  %p86_p4 = scmp.eq.s32.totalorder %s661_s14, 1 }
   0x8   : > { %s1006_s18 = scalar_select %p67_p1, %s944_s11, %s69_s16  }
   0x9   : > { %p1008_p5 = por %p80_p2, %p79_p0  ;;  %p1012_p6 = por %p86_p4, %p85_p3 }
   0xa   : > { %p664_p7 = scmp.ge.s32.totalorder %s948_s12, 1  ;;  %p115_p8 = scmp.lt.s32.totalorder %s948_s12, 3 }
   0xc   : > { %p116_p9 = pnand %p664_p7, %p115_p8 }
   0xd   : > { %p136_p10 = scmp.lt.s32.totalorder (!%p116_p9), %s991_s13, 1  ;;  %s952_s21 = smov (!%p116_p9), 120  }
   0xe   : > { %119 = sbr.rel (%p116_p9) target bundleno = 1143 (0x477), region = 28  ;;  %s134_s22 = sand.u32 (!%p116_p9), 1, %s940_s10  }
   0xf   : > { %s690_s23 = sshll.u32 (!%p116_p9), %s991_s13, 4  ;;  %s135_s24 = scalar_lea.vmem (!%p116_p9), [#allocation2], %s134_s22 }
  0x10   : > { %s606_s25 = sshll.u32 (!%p116_p9), %s135_s24, 4  ;;  %s1138_s28 = scalar_lea.hbm (!%p116_p9), %s1182_s2, %s690_s23  ;;  %s1140_s25 = int_to_ptr.vmem [resolvable:$true] %s606_s25 }
  0x11   : > { %s594_s29 = scalar_lea.sflag (!%p116_p9), [#allocation3], %s134_s22 }
  0x13   : > { %v154_v0 = vld [vmem:[%s1181_s1 + $0x30] sm:$0x1]  ;;  %vm177_vm0 = vcmask 1040384   ;;  %v950_v1 = vmov 0.0   ;;  %v153_v2 = vld [vmem:[%s1181_s1 + $0x28] sm:$0xff]  ;;  %vm951_vm1 = vmmov 0  }
  0x14   : > { %729 = vmatprep.subr.mxu0 %v950_v1  ;;  %764 = vmatprep.subr.mxu1 %v950_v1  ;;  %v152_v3 = vld [vmem:[%s1181_s1 + $0x20] sm:$0xff]  ;;  %s137_s27 = scalar_select %p136_p10, %s991_s13, 1  ;;  %v151_v4 = vld [vmem:[%s1181_s1 + $0x18] sm:$0xff]  ;;  %v150_v5 = vld [vmem:[%s1181_s1 + $0x10] sm:$0xff]  ;;  %vm155_vm2 = vcmask 400384   ;;  %vm302_vm3 = vcmask 64512  }
  0x15   : > { %730 = vmatpush3.msk.msra.mxu0 %vm177_vm0, %v154_v0  ;;  %743 = vmatprep.mubr.msk.f32.mxu0 %vm951_vm1, %v950_v1  ;;  %v149_v6 = vld [vmem:[%s1181_s1 + $0x8] sm:$0xff]  ;;  %v148_v7 = vld [vmem:[%s1181_s1] sm:$0xff]  ;;  %vm449_vm4 = vcmask 393216   ;;  %s954_s13 = smov [#allocation2]  }
  0x16   : > { %731 = vmatprep.subr.mxu0 %v950_v1  ;;  %778 = vmatprep.mubr.msk.f32.mxu1 %vm951_vm1, %v950_v1  ;;  %s816_s30 = smul.u32 56, %s137_s27  ;;  %s892_s3 = sshll.u32 %s954_s13, 4  ;;  %s893_s3 = int_to_ptr.vmem [resolvable:$false] %s892_s3 }
  0x17   : > { %732 = vmatpush3.msra.mxu0 %v153_v2  ;;  %s894_s4 = scalar_lea.vmem %s893_s3, 32  ;;  %p895_p0 = scmp.lt.s32.totalorder %s1140_s25, %s893_s3 }
  0x18   : > { %733 = vmatprep.subr.mxu0 %v950_v1  ;;  %s140_s14 = scalar_lea.vmem %s1180_s0, %s816_s30  ;;  %s888_s30 = scalar_lea.vmem %s1140_s25, 16 }
  0x19   : > { %734 = vmatpush3.msra.mxu0 %v152_v3  ;;  %v141_v8 = vld [vmem:[%s140_s14] sm:$0xff]  ;;  %v142_v9 = vld [vmem:[%s140_s14 + $0x8] sm:$0xff]  ;;  %v143_v10 = vld [vmem:[%s140_s14 + $0x10] sm:$0xff]  ;;  %p889_p11 = scmp.ne.s32.totalorder %s1140_s25, %s888_s30  ;;  %p896_p1 = scmp.lt.s32.totalorder %s894_s4, %s888_s30 }
  0x1a   : > { %735 = vmatprep.subr.mxu0 %v950_v1  ;;  %v144_v11 = vld [vmem:[%s140_s14 + $0x18] sm:$0xff]  ;;  %v145_v12 = vld [vmem:[%s140_s14 + $0x20] sm:$0xff]  ;;  %v146_v13 = vld [vmem:[%s140_s14 + $0x28] sm:$0xff] }
  0x1b   : > { %736 = vmatpush3.msra.mxu0 %v151_v4  ;;  %v147_v14 = vld [vmem:[%s140_s14 + $0x30] sm:$0x1]  ;;  %p890_p12 = pnand %p889_p11, %p1008_p5  ;;  %p897_p2 = por %p896_p1, %p895_p0 }
  0x1c   : > { %737 = vmatprep.subr.mxu0 %v950_v1 }
  0x1d   : > { %738 = vmatpush3.msra.mxu0 %v150_v5  ;;  %p891_p13 = pneg %p890_p12 }
  0x1e   : > { %739 = vmatprep.subr.mxu0 %v950_v1 }
  0x1f   : > { %740 = vmatpush3.msra.mxu0 %v149_v6  ;;  %p898_p3 = pnand %p897_p2, %p891_p13 }
  0x20   : > { %741 = vmatprep.subr.mxu0 %v950_v1 }
  0x21   : > { %742 = vmatpush3.msra.mxu0 %v148_v7 }
  0x22   : > { %744 = vmatmul.mubr.msk.f32.vlgmr.msra.gmra.mxu0 %vm155_vm2, %v141_v8  ;;  %799 = vmatprep.subr.mxu0 %v950_v1 }
  0x23   : > { %746 = vmatprep.mubr.msk.f32.mxu0 %vm951_vm1, %v950_v1 }
  0x26   : > { %747 = vmatmul.mubr.msk.f32.gmra.mxu0 %vm155_vm2, %v142_v9 }
  0x27   : > { %749 = vmatprep.mubr.msk.f32.mxu0 %vm951_vm1, %v950_v1 }
  0x2a   : > { %750 = vmatmul.mubr.msk.f32.gmra.mxu0 %vm155_vm2, %v143_v10 }
  0x2b   : > { %752 = vmatprep.mubr.msk.f32.mxu0 %vm951_vm1, %v950_v1 }
  0x2e   : > { %753 = vmatmul.mubr.msk.f32.gmra.mxu0 %vm155_vm2, %v144_v11 }
  0x2f   : > { %755 = vmatprep.mubr.msk.f32.mxu0 %vm951_vm1, %v950_v1 }
  0x32   : > { %756 = vmatmul.mubr.msk.f32.gmra.mxu0 %vm155_vm2, %v145_v12 }
  0x33   : > { %758 = vmatprep.mubr.msk.f32.mxu0 %vm951_vm1, %v950_v1 }
  0x36   : > { %759 = vmatmul.mubr.msk.f32.gmra.mxu0 %vm155_vm2, %v146_v13 }
  0x37   : > { %761 = vmatprep.mubr.msk.f32.mxu0 %vm951_vm1, %v950_v1 }
  0x3a   : > { %762 = vmatmul.mubr.msk.f32.gmra.mxu0 %vm155_vm2, %v147_v14 }
  0x3b   : > { %813 = vmatprep.mubr.msk.f32.mxu0 %vm951_vm1, %v950_v1 }
  0xe2   : > { %v247_v15 = vpop.f32.mrf.mxu0 }
  0xe4   : > { %v745_v16 = vpop.f32.mrf.mxu0 }
  0xe6   : > { %v252_v17 = vpop.f32.mrf.mxu0 }
  0xe8   : > { %v748_v18 = vpop.f32.mrf.mxu0 }
  0xea   : > { %v257_v19 = vpop.f32.mrf.mxu0 }
  0xec   : > { %v751_v20 = vpop.f32.mrf.mxu0 }
  0xee   : > { %v262_v21 = vpop.f32.mrf.mxu0 }
  0xf0   : > { %v754_v22 = vpop.f32.mrf.mxu0 }
  0xf2   : > { %v267_v23 = vpop.f32.mrf.mxu0 }
  0xf3   : > { %296 = vrot.lane.b32.xlu1 %v267_v23, %s952_s21 }
  0xf4   : > { %v757_v24 = vpop.f32.mrf.mxu0 }
  0xf6   : > { %v272_v25 = vpop.f32.mrf.mxu0 }
  0xf7   : > { %294 = vrot.lane.b32.xlu1 %v262_v21, %s952_s21 }
  0xf8   : > { %v760_v26 = vpop.f32.mrf.mxu0 }
  0xfa   : > { %v277_v27 = vpop.f32.mrf.mxu0 }
  0xfb   : > { %290 = vrot.lane.b32.xlu1 %v252_v17, %s952_s21  ;;  %300 = vrot.lane.b32.xlu0 %v277_v27, %s952_s21 }
  0xfc   : > { %v763_v28 = vpop.f32.mrf.mxu0 }
  0xff   : > { %298 = vrot.lane.b32.xlu0 %v272_v25, %s952_s21 }
 0x103   : > { %292 = vrot.lane.b32.xlu0 %v257_v19, %s952_s21 }
 0x107   : > { %288 = vrot.lane.b32.xlu0 %v247_v15, %s952_s21 }
 0x165   : > { %v297_v31 = vpop.permute.xlu1 %296 }
 0x169   : > { %v295_v32 = vpop.permute.xlu1 %294 }
 0x16d   : > { %v301_v29 = vpop.permute.xlu0 %300  ;;  %v291_v34 = vpop.permute.xlu1 %290 }
 0x16e   : > { %765 = vmatpush3.xpose.msk.msra.mxu1 %vm302_vm3, %v301_v29 }
 0x16f   : > { %766 = vmatprep.subr.mxu1 %v950_v1 }
 0x171   : > { %v299_v30 = vpop.permute.xlu0 %298 }
 0x172   : > { %767 = vmatpush3.xpose.msk.msra.mxu1 %vm302_vm3, %v299_v30 }
 0x173   : > { %768 = vmatprep.subr.mxu1 %v950_v1 }
 0x175   : > { %v293_v33 = vpop.permute.xlu0 %292 }
 0x176   : > { %769 = vmatpush3.xpose.msk.msra.mxu1 %vm302_vm3, %v297_v31 }
 0x177   : > { %770 = vmatprep.subr.mxu1 %v950_v1 }
 0x179   : > { %v289_v35 = vpop.permute.xlu0 %288 }
 0x17a   : > { %771 = vmatpush3.xpose.msk.msra.mxu1 %vm302_vm3, %v295_v32 }
 0x17b   : > { %772 = vmatprep.subr.mxu1 %v950_v1 }
 0x17e   : > { %773 = vmatpush3.xpose.msk.msra.mxu1 %vm302_vm3, %v293_v33 }
 0x17f   : > { %774 = vmatprep.subr.mxu1 %v950_v1 }
 0x182   : > { %775 = vmatpush3.xpose.msk.msra.mxu1 %vm302_vm3, %v291_v34 }
 0x183   : > { %776 = vmatprep.subr.mxu1 %v950_v1 }
 0x186   : > { %777 = vmatpush3.xpose.msk.msra.mxu1 %vm302_vm3, %v289_v35 }
 0x189   : > { %779 = vmatmul.mubr.msk.f32.vlgmr.msra.gmra.mxu1 %vm302_vm3, %v247_v15 }
 0x18a   : > { %781 = vmatprep.mubr.msk.f32.mxu1 %vm951_vm1, %v950_v1 }
 0x18d   : > { %782 = vmatmul.mubr.msk.f32.gmra.mxu1 %vm302_vm3, %v252_v17 }
 0x18e   : > { %784 = vmatprep.mubr.msk.f32.mxu1 %vm951_vm1, %v950_v1 }
 0x191   : > { %785 = vmatmul.mubr.msk.f32.gmra.mxu1 %vm302_vm3, %v257_v19 }
 0x192   : > { %787 = vmatprep.mubr.msk.f32.mxu1 %vm951_vm1, %v950_v1 }
 0x195   : > { %788 = vmatmul.mubr.msk.f32.gmra.mxu1 %vm302_vm3, %v262_v21 }
 0x196   : > { %790 = vmatprep.mubr.msk.f32.mxu1 %vm951_vm1, %v950_v1 }
 0x199   : > { %791 = vmatmul.mubr.msk.f32.gmra.mxu1 %vm302_vm3, %v267_v23 }
 0x19a   : > { %793 = vmatprep.mubr.msk.f32.mxu1 %vm951_vm1, %v950_v1 }
 0x19d   : > { %794 = vmatmul.mubr.msk.f32.gmra.mxu1 %vm302_vm3, %v272_v25 }
 0x19e   : > { %796 = vmatprep.mubr.msk.f32.mxu1 %vm951_vm1, %v950_v1 }
 0x1a1   : > { %797 = vmatmul.mubr.msk.f32.gmra.mxu1 %vm302_vm3, %v277_v27 }
 0x249   : > { %v397_v36 = vpop.f32.mrf.mxu1 }
 0x24a   : > { %v431_v55 = vsel %vm155_vm2, %v397_v36, -inf }
 0x24b   : > { %v780_v37 = vpop.f32.mrf.mxu1 }
 0x24d   : > { %v402_v38 = vpop.f32.mrf.mxu1 }
 0x24e   : > { %v434_v56 = vsel %vm155_vm2, %v402_v38, -inf }
 0x24f   : > { %v783_v39 = vpop.f32.mrf.mxu1 }
 0x251   : > { %v407_v40 = vpop.f32.mrf.mxu1 }
 0x252   : > { %v437_v53 = vsel %vm155_vm2, %v407_v40, -inf }
 0x253   : > { %v786_v41 = vpop.f32.mrf.mxu1 }
 0x255   : > { %v412_v42 = vpop.f32.mrf.mxu1 }
 0x256   : > { %v440_v54 = vsel %vm155_vm2, %v412_v42, -inf }
 0x257   : > { %v789_v43 = vpop.f32.mrf.mxu1 }
 0x259   : > { %v417_v44 = vpop.f32.mrf.mxu1 }
 0x25a   : > { %v443_v50 = vsel %vm155_vm2, %v417_v44, -inf }
 0x25b   : > { %v792_v45 = vpop.f32.mrf.mxu1 }
 0x25d   : > { %v422_v46 = vpop.f32.mrf.mxu1 }
 0x25e   : > { %v446_v47 = vsel %vm155_vm2, %v422_v46, -inf }
 0x25f   : > { %447 = vmax.xlane.f32.xlu0 %v446_v47  ;;  %v795_v48 = vpop.f32.mrf.mxu1 }
 0x261   : > { %v427_v49 = vpop.f32.mrf.mxu1 }
 0x262   : > { %v450_v51 = vsel %vm449_vm4, %v427_v49, -inf }
 0x263   : > { %444 = vmax.xlane.f32.xlu0 %v443_v50  ;;  %451 = vmax.xlane.f32.xlu1 %v450_v51  ;;  %v798_v52 = vpop.f32.mrf.mxu1  ;;  %v953_v50 = vmov 1.0  }
 0x267   : > { %438 = vmax.xlane.f32.xlu0 %v437_v53  ;;  %441 = vmax.xlane.f32.xlu1 %v440_v54 }
 0x26b   : > { %432 = vmax.xlane.f32.xlu0 %v431_v55  ;;  %435 = vmax.xlane.f32.xlu1 %v434_v56 }
 0x2e8   : > { %v448_v57 = vpop.xlane.xlu0 %447 }
 0x2e9   : > { %v458_v58 = vsub.f32 %v422_v46, %v448_v57 }
 0x2eb   : > { %v470_v59 = vmul.f32 1.442695, %v458_v58 }
 0x2ec   : > { %v445_v60 = vpop.xlane.xlu0 %444  ;;  %v452_v61 = vpop.xlane.xlu1 %451 }
 0x2ed   : > { %860 = vpow2.f32 %v470_v59  ;;  %v457_v62 = vsub.f32 %v417_v44, %v445_v60  ;;  %v459_v63 = vsub.f32 %v427_v49, %v452_v61 }
 0x2ef   : > { %v472_v0 = vmul.f32 1.442695, %v459_v63  ;;  %v468_v2 = vmul.f32 1.442695, %v457_v62 }
 0x2f0   : > { %v439_v3 = vpop.xlane.xlu0 %438  ;;  %v442_v4 = vpop.xlane.xlu1 %441 }
 0x2f1   : > { %v455_v5 = vsub.f32 %v407_v40, %v439_v3  ;;  %v456_v6 = vsub.f32 %v412_v42, %v442_v4  ;;  %862 = vpow2.f32 %v472_v0 }
 0x2f2   : > { %864 = vpow2.f32 %v468_v2 }
 0x2f3   : > { %v466_v7 = vmul.f32 1.442695, %v456_v6  ;;  %v464_v8 = vmul.f32 1.442695, %v455_v5 }
 0x2f4   : > { %v433_v9 = vpop.xlane.xlu0 %432  ;;  %v436_v10 = vpop.xlane.xlu1 %435 }
 0x2f5   : > { %v453_v11 = vsub.f32 %v397_v36, %v433_v9  ;;  %v454_v12 = vsub.f32 %v402_v38, %v436_v10  ;;  %866 = vpow2.f32 %v466_v7 }
 0x2f6   : > { %868 = vpow2.f32 %v464_v8 }
 0x2f7   : > { %v462_v13 = vmul.f32 1.442695, %v454_v12  ;;  %v460_v14 = vmul.f32 1.442695, %v453_v11 }
 0x2f9   : > { %870 = vpow2.f32 %v462_v13 }
 0x2fa   : > { %v861_v15 = vpop.eup %860  ;;  %872 = vpow2.f32 %v460_v14 }
 0x2fb   : > { %v489_v16 = vsel %vm155_vm2, %v861_v15, 0.0 }
 0x2fc   : > { %490 = vadd.xlane.f32.xlu0 %v489_v16 }
 0x2fe   : > { %v863_v17 = vpop.eup %862 }
 0x2ff   : > { %v492_v18 = vsel %vm449_vm4, %v863_v17, 0.0  ;;  %v865_v19 = vpop.eup %864 }
 0x300   : > { %493 = vadd.xlane.f32.xlu1 %v492_v18  ;;  %v486_v21 = vsel %vm155_vm2, %v865_v19, 0.0 }
 0x302   : > { %v867_v20 = vpop.eup %866 }
 0x303   : > { %v483_v22 = vsel %vm155_vm2, %v867_v20, 0.0  ;;  %v869_v23 = vpop.eup %868 }
 0x304   : > { %487 = vadd.xlane.f32.xlu1 %v486_v21  ;;  %484 = vadd.xlane.f32.xlu0 %v483_v22  ;;  %v480_v25 = vsel %vm155_vm2, %v869_v23, 0.0 }
 0x306   : > { %v871_v24 = vpop.eup %870 }
 0x307   : > { %v477_v26 = vsel %vm155_vm2, %v871_v24, 0.0  ;;  %v873_v27 = vpop.eup %872 }
 0x308   : > { %481 = vadd.xlane.f32.xlu1 %v480_v25  ;;  %478 = vadd.xlane.f32.xlu0 %v477_v26  ;;  %v474_v28 = vsel %vm155_vm2, %v873_v27, 0.0 }
 0x30c   : > { %475 = vadd.xlane.f32.xlu1 %v474_v28 }
 0x385   : > { %v491_v29 = vpop.xlane.xlu0 %490 }
 0x386   : > { %874 = vrcp.f32 %v491_v29 }
 0x389   : > { %v494_v30 = vpop.xlane.xlu1 %493 }
 0x38a   : > { %876 = vrcp.f32 %v494_v30 }
 0x38d   : > { %v485_v31 = vpop.xlane.xlu0 %484  ;;  %v488_v32 = vpop.xlane.xlu1 %487 }
 0x38e   : > { %878 = vrcp.f32 %v485_v31 }
 0x38f   : > { %880 = vrcp.f32 %v488_v32 }
 0x391   : > { %v479_v33 = vpop.xlane.xlu0 %478  ;;  %v482_v34 = vpop.xlane.xlu1 %481 }
 0x392   : > { %882 = vrcp.f32 %v479_v33 }
 0x393   : > { %884 = vrcp.f32 %v482_v34  ;;  %v875_v36 = vpop.eup %874 }
 0x394   : > { %v514_v39 = vmul.f32 %v875_v36, %v861_v15 }
 0x395   : > { %v476_v35 = vpop.xlane.xlu1 %475 }
 0x396   : > { %886 = vrcp.f32 %v476_v35 }
 0x397   : > { %v877_v37 = vpop.eup %876 }
 0x398   : > { %v515_v38 = vmul.f32 %v877_v37, %v863_v17 }
 0x39a   : > { %800 = vmatpush3.msk.msra.mxu0 %vm177_vm0, %v515_v38 }
 0x39b   : > { %v879_v40 = vpop.eup %878  ;;  %801 = vmatprep.subr.mxu0 %v950_v1 }
 0x39c   : > { %v881_v41 = vpop.eup %880  ;;  %802 = vmatpush3.msra.mxu0 %v514_v39  ;;  %v512_v44 = vmul.f32 %v879_v40, %v867_v20 }
 0x39d   : > { %803 = vmatprep.subr.mxu0 %v950_v1  ;;  %v513_v42 = vmul.f32 %v881_v41, %v865_v19 }
 0x39f   : > { %v883_v43 = vpop.eup %882  ;;  %804 = vmatpush3.msra.mxu0 %v513_v42 }
 0x3a0   : > { %v885_v45 = vpop.eup %884  ;;  %805 = vmatprep.subr.mxu0 %v950_v1  ;;  %v510_v48 = vmul.f32 %v883_v43, %v871_v24 }
 0x3a1   : > { %806 = vmatpush3.msra.mxu0 %v512_v44  ;;  %v511_v46 = vmul.f32 %v885_v45, %v869_v23 }
 0x3a2   : > { %807 = vmatprep.subr.mxu0 %v950_v1 }
 0x3a3   : > { %v887_v47 = vpop.eup %886  ;;  %808 = vmatpush3.msra.mxu0 %v511_v46 }
 0x3a4   : > { %809 = vmatprep.subr.mxu0 %v950_v1  ;;  %v509_v49 = vmul.f32 %v887_v47, %v873_v27 }
 0x3a5   : > { %810 = vmatpush3.msra.mxu0 %v510_v48 }
 0x3a6   : > { %811 = vmatprep.subr.mxu0 %v950_v1 }
 0x3a7   : > { %812 = vmatpush3.msra.mxu0 %v509_v49 }
 0x3a8   : > { %814 = vmatmul.mubr.msk.f32.vlgmr.msra.gmra.mxu0 %vm155_vm2, %v953_v50 }
 0x468   : > { %v588_v1 = vpop.f32.mrf.mxu0 }
 0x469   : > { %592 = vst.msk [vmem:[%s135_s24] sm:$0x1] %vm449_vm4, %v588_v1 }
 0x46a   : > { %v815_v51 = vpop.f32.mrf.mxu0 }
 0x46b   : > { %901 = shalt.err (!%p898_p3)
}
 0x46c   : > { %s902_s5 = scalar_lea.hbm %s1138_s28, 16  ;;  %s906_s8 = scalar_lea.hbm %s1182_s2, 32 }
 0x46d   : > { %p903_p4 = scmp.ne.s32.totalorder %s1138_s28, %s902_s5  ;;  %p907_p9 = scmp.lt.s32.totalorder %s1138_s28, %s1182_s2 }
 0x46e   : > { %p908_p10 = scmp.lt.s32.totalorder %s906_s8, %s902_s5 }
 0x46f   : > { %p904_p7 = pnand %p903_p4, %p1008_p5 }
 0x470   : > { %p909_p11 = por %p908_p10, %p907_p9 }
 0x471   : > { %p905_p8 = pneg %p904_p7 }
 0x473   : > { %p910_p12 = pnand %p909_p11, %p905_p8 }
 0x475   : > { %913 = shalt.err (!%p910_p12)
}
 0x476   : > { %817 = dma.vmem_to_hbm [thread:$0]  (%p1008_p5), %s1140_s25, 16, %s1138_s28, %s594_s29  }
 0x477 PF: > { %p823_p13 = scmp.ge.s32.totalorder %s948_s12, 2  ;;  %s618_s17 = sand.u32 1, %s936_s9  }
 0x478   : > { %s619_s21 = scalar_lea.sflag [#allocation3], %s618_s17 }
 0x479   : > { %p820_p0 = pnand %p823_p13, %p1012_p6 }
 0x47b   : > { %p821_p1 = pneg %p820_p0 }
 0x47d   : > { %931 = dma.done.wait (%p821_p1), %s619_s21, 16  }
 0x47e   : > { %933 = vsyncadd (%p821_p1), %s619_s21, 4294967280  ;;  %p12_p2 = scmp.ge.s32.totalorder %s995_s15, 4   ;;  %s1185_s9 = smov %s940_s10 }
 0x47f   : > { %s1186_s10 = smov %s944_s11  ;;  %s1187_s11 = smov %s1006_s18 }
 0x480   : > { %s1188_s12 = smov %s995_s15  ;;  %14 = sbr.rel (!%p12_p2) target bundleno = 3 (0x3), region = 63 }
 0x485   :  { %623 = vsyncpa [#allocation3], 1 }
 0x486   :  { %625 = vsyncpa [#allocation3 + $0x1], 1 }

</bundles_post_ra>
